<compile_context>
chip_gen: v7x
topology: tpu7x:2x2x1
jax: 0.10.0
libtpu: 0.0.40
codegen_flags: <defaults>
</compile_context>

<pallas_src>
import functools
import math

import jax
import jax.numpy as jnp
from jax.experimental import pallas as pl
from jax.experimental.pallas import tpu as pltpu

_LANE = 128


def _optimized_activation_kernel(x_ref, o_ref, *, temperature, true_vocab):
    # The whole (padded) vocab dim is resident in this tile, so both per-row
    # reductions are in-kernel lane reductions.
    x = x_ref[...].astype(jnp.float32)
    vocab_p = x.shape[-1]

    # scale = mean(|x|) over the true vocab (zero-padded lanes contribute 0).
    abs_sum = jnp.sum(jnp.abs(x), axis=-1, keepdims=True)
    scale = abs_sum * (1.0 / float(true_vocab))

    # x / (scale + 1e-6) * temperature  ->  per-row reciprocal + VPU multiply.
    inv_scale = pl.reciprocal(scale + 1e-6) * temperature
    activated = jax.nn.sigmoid(x * inv_scale)

    if vocab_p != true_vocab:
        # Zero padded lanes so they don't pollute the normalization sum.
        lane = jax.lax.broadcasted_iota(jnp.int32, activated.shape, dimension=1)
        activated = jnp.where(lane < true_vocab, activated, 0.0)

    denom = jnp.sum(activated, axis=-1, keepdims=True) + 1e-10
    o_ref[...] = (activated * pl.reciprocal(denom)).astype(o_ref.dtype)


def _pick_row_tile(rows, vocab_p, *, max_row_tile=1024, elem_budget=1 << 20):
    """Largest 8-aligned row tile whose f32 tile stays ~4 MiB.

    With double-buffered in/out plus ~3 live f32 temporaries this keeps total
    VMEM usage well under v7x's 64 MiB (and trivially under v5e/v6e's 128 MiB).
    """
    tr = min(max_row_tile, max(8, elem_budget // max(vocab_p, 1)))
    tr = max(8, (tr // 8) * 8)
    rows_8 = ((rows + 7) // 8) * 8
    tr = max(8, (min(tr, rows_8) // 8) * 8)
    # Keep >=2 grid steps when possible so v7x's two TensorCores both get work.
    while tr > 8 and pl.cdiv(rows, tr) < 2:
        tr = max(8, ((tr // 2) // 8) * 8)
    return tr


def optimized_activation(x, temperature=1.0):
    """OptimizedActivation.forward: x (..., vocab) -> normalized probs (same shape/dtype)."""
    orig_shape = x.shape
    vocab = orig_shape[-1]
    rows = math.prod(orig_shape[:-1]) if len(orig_shape) > 1 else 1
    x2 = x.reshape(rows, vocab)

    # Pad vocab to a lane multiple (unmasked vst) and rows up to the row tile
    # (cdiv grid; padded rows are computed on zeros and sliced off afterwards).
    vocab_p = pl.cdiv(vocab, _LANE) * _LANE
    tr = _pick_row_tile(rows, vocab_p)
    rows_p = pl.cdiv(rows, tr) * tr
    if rows_p != rows or vocab_p != vocab:
        x2 = jnp.pad(x2, ((0, rows_p - rows), (0, vocab_p - vocab)))

    grid = rows_p // tr
    itemsize = jnp.dtype(x.dtype).itemsize
    cost = pl.CostEstimate(
        flops=int(10 * rows * vocab),
        transcendentals=int(rows * vocab),            # one sigmoid (exp) per element
        bytes_accessed=int(2 * rows * vocab * itemsize),
    )
    kernel = functools.partial(
        _optimized_activation_kernel,
        temperature=float(temperature),
        true_vocab=int(vocab),
    )
    out = pl.pallas_call(
        kernel,
        out_shape=jax.ShapeDtypeStruct((rows_p, vocab_p), x.dtype),
        grid_spec=pltpu.PrefetchScalarGridSpec(
            num_scalar_prefetch=0,
            grid=(grid,),
            in_specs=[pl.BlockSpec((tr, vocab_p), lambda i: (i, 0))],
            out_specs=pl.BlockSpec((tr, vocab_p), lambda i: (i, 0)),
        ),
        compiler_params=pltpu.CompilerParams(
            dimension_semantics=("parallel",),
            vmem_limit_bytes=48 * 1024 * 1024,
        ),
        cost_estimate=cost,
    )(x2)
    if rows_p != rows or vocab_p != vocab:
        out = out[:rows, :vocab]
    return out.reshape(orig_shape)


# TODO(synk): OptimizedActivation.loss (label-smoothed CE over these probs) is not
# kernelized; compose it from optimized_activation() in plain JAX on the host side.


def _reference(x, temperature=1.0):
    x = x.astype(jnp.float32)
    scale = jnp.mean(jnp.abs(x), axis=-1, keepdims=True)
    x_scaled = x / (scale + 1e-6) * temperature
    activated = jax.nn.sigmoid(x_scaled)
    return activated / (jnp.sum(activated, axis=-1, keepdims=True) + 1e-10)


if __name__ == "__main__":
    key = jax.random.PRNGKey(0)
    batch, seq, vocab = 2, 8, 32
    x = jax.random.normal(key, (batch, seq, vocab), dtype=jnp.float32)

    out = optimized_activation(x, temperature=1.0)
    out = jax.block_until_ready(out)

    ref = _reference(x, temperature=1.0)
    assert out.shape == x.shape
    assert out.dtype == x.dtype
    assert jnp.allclose(out, ref, atol=1e-5, rtol=1e-5), float(jnp.max(jnp.abs(out - ref)))
    print("KERNEL_OK")
</pallas_src>

<mosaic_0001>
module attributes {stable_mosaic.version = 11 : i64} {
  func.func @_optimized_activation_kernel(%arg0: i32, %arg1: memref<8x128xf32, #tpu.memory_space<vmem>>, %arg2: memref<8x128xf32, #tpu.memory_space<vmem>>) attributes {dimension_semantics = [#tpu.dimension_semantics<parallel>], iteration_bounds = array<i64: 2>, scalar_prefetch = 0 : i64, scratch_operands = 0 : i64, tpu.core_type = #tpu.core_type<tc>, window_params = [{transform_indices = @transform_0, window_bounds = array<i64: 8, 128>}, {transform_indices = @transform_1, window_bounds = array<i64: 8, 128>}]} {
    %c0 = arith.constant 0 : index
    %c0_0 = arith.constant 0 : index
    %0 = vector.load %arg1[%c0, %c0_0] : memref<8x128xf32, #tpu.memory_space<vmem>>, vector<8x128xf32>
    %1 = math.absf %0 : vector<8x128xf32>
    %cst = arith.constant dense<0.000000e+00> : vector<8xf32>
    %2 = vector.multi_reduction <add>, %1, %cst [1] : vector<8x128xf32> to vector<8xf32>
    %3 = vector.shape_cast %2 : vector<8xf32> to vector<8x1xf32>
    %cst_1 = arith.constant 3.125000e-02 : f32
    %4 = vector.broadcast %cst_1 : f32 to vector<8x1xf32>
    %5 = arith.mulf %3, %4 : vector<8x1xf32>
    %cst_2 = arith.constant 9.99999997E-7 : f32
    %6 = vector.broadcast %cst_2 : f32 to vector<8x1xf32>
    %7 = arith.addf %5, %6 : vector<8x1xf32>
    %8 = tpu.reciprocal %7 : vector<8x1xf32> -> vector<8x1xf32>
    %cst_3 = arith.constant 1.000000e+00 : f32
    %9 = vector.broadcast %cst_3 : f32 to vector<8x1xf32>
    %10 = arith.mulf %8, %9 : vector<8x1xf32>
    %11 = vector.broadcast %10 : vector<8x1xf32> to vector<8x128xf32>
    %12 = arith.mulf %0, %11 : vector<8x128xf32>
    %13 = arith.negf %12 : vector<8x128xf32>
    %14 = math.exp %13 : vector<8x128xf32>
    %cst_4 = arith.constant 1.000000e+00 : f32
    %15 = vector.broadcast %cst_4 : f32 to vector<8x128xf32>
    %16 = arith.addf %15, %14 : vector<8x128xf32>
    %17 = arith.divf %15, %16 : vector<8x128xf32>
    %18 = tpu.iota {dimensions = array<i32: 1>} : vector<8x128xi32>
    %c32_i32 = arith.constant 32 : i32
    %19 = vector.broadcast %c32_i32 : i32 to vector<8x128xi32>
    %20 = arith.cmpi slt, %18, %19 : vector<8x128xi32>
    %cst_5 = arith.constant 0.000000e+00 : f32
    %21 = vector.broadcast %cst_5 : f32 to vector<8x128xf32>
    %22 = arith.select %20, %17, %21 : vector<8x128xi1>, vector<8x128xf32>
    %cst_6 = arith.constant dense<0.000000e+00> : vector<8xf32>
    %23 = vector.multi_reduction <add>, %22, %cst_6 [1] : vector<8x128xf32> to vector<8xf32>
    %24 = vector.shape_cast %23 : vector<8xf32> to vector<8x1xf32>
    %cst_7 = arith.constant 1.000000e-10 : f32
    %25 = vector.broadcast %cst_7 : f32 to vector<8x1xf32>
    %26 = arith.addf %24, %25 : vector<8x1xf32>
    %27 = tpu.reciprocal %26 : vector<8x1xf32> -> vector<8x1xf32>
    %28 = vector.broadcast %27 : vector<8x1xf32> to vector<8x128xf32>
    %29 = arith.mulf %22, %28 : vector<8x128xf32>
    %c0_8 = arith.constant 0 : index
    %c0_9 = arith.constant 0 : index
    %30 = vector.load %arg2[%c0_8, %c0_9] : memref<8x128xf32, #tpu.memory_space<vmem>>, vector<8x128xf32>
    tpu.vector_store %arg2[%c0_8, %c0_9], %29 {strides = array<i32>} : memref<8x128xf32, #tpu.memory_space<vmem>>, vector<8x128xf32>,
    return
  }
  func.func @transform_0(%arg0: i32) -> (i32, i32) {
    %c0_i32 = arith.constant 0 : i32
    %c0_i32_0 = arith.constant 0 : i32
    return %arg0, %c0_i32 : i32, i32
  }
  func.func @transform_1(%arg0: i32) -> (i32, i32) {
    %c0_i32 = arith.constant 0 : i32
    %c0_i32_0 = arith.constant 0 : i32
    return %arg0, %c0_i32 : i32, i32
  }
}

</mosaic_0001>

<bundles_post_ra>
// kernel: tpu_custom_call.1
= control target key start
LH: loop header
LB: loop body
LE: loop exit
PB: predicated region body
PF: predicated region fallthrough
CT: control target
= control target key end

     0   :  { %6 = vsyncpa [#allocation3], 0  ;;  %s578_s0 = inlined_call_operand.hbm [shape: f32[16,128], index: 0, kind: input, shape index: {}]   ;;  %s579_s1 = inlined_call_operand.hbm [shape: f32[16,128], index: 1, kind: output, shape index: {}]  }
   0x1   :  { %8 = vsyncpa [#allocation3 + $0x1], 0 }
   0x2   :  { %9 = vsyncpa [#allocation4], 0 }
   0x3   :  { %11 = vsyncpa [#allocation4 + $0x1], 0  ;;  %s417_s6 = smov 0   ;;  %s419_s7 = smov 0  }
   0x4   :  { %s421_s8 = smov 0   ;;  %s423_s9 = smov 0  }
   0x5 LB: > { %s438_s10 = sadd.s32 4294967295, %s403_s9   ;;  %s240_s11 = sadd.s32 4294967294, %s403_s9   ;;  %s403_s9 = sphi %s423_s9, %s594_s9   ;;  %s399_s8 = sphi %s421_s8, %s593_s8   ;;  %s395_s7 = sphi %s419_s7, %s592_s7   ;;  %s391_s6 = sphi %s417_s6, %s591_s6  }
   0x6   : > { %s442_s12 = sadd.s32 1, %s403_s9   ;;  %s24_s13 = sadd.s32 1, %s399_s8 }
   0x7   : > { %s21_s14 = ssub.s32 %s403_s9, %s442_s12  ;;  %p31_p0 = scmp.ne.s32.totalorder %s399_s8, %s395_s7 }
   0x8   : > { %p22_p1 = scmp.eq.s32.totalorder %s21_s14, 0  ;;  %p32_p2 = scmp.eq.s32.totalorder %s403_s9, 0 }
   0x9   : > { %p37_p3 = scmp.ne.s32.totalorder %s395_s7, %s391_s6  ;;  %p38_p4 = scmp.eq.s32.totalorder %s438_s10, 0 }
   0xa   : > { %s454_s15 = scalar_select %p22_p1, %s399_s8, %s24_s13  }
   0xb   : > { %p456_p5 = por %p32_p2, %p31_p0  ;;  %p460_p6 = por %p38_p4, %p37_p3 }
   0xc   : > { %p61_p7 = scmp.eq.s32.totalorder %s438_s10, 1  ;;  %p67_p8 = scmp.eq.s32.totalorder %s240_s11, 1 }
   0xd   : > { %p265_p10 = scmp.lt.s32.totalorder %s403_s9, 2  ;;  %s87_s20 = sand.u32 1, %s399_s8  }
   0xe   : > { %p467_p11 = por %p61_p7, %p31_p0  ;;  %p471_p12 = por %p67_p8, %p37_p3 }
   0xf   : > { %s244_s21 = sshll.u32 %s403_s9, 7  ;;  %s243_s22 = sshll.u32 %s87_s20, 3 }
  0x10   : > { %s583_s18 = scalar_select %p467_p11, 1, 0 }
  0x11   : > { %s584_s19 = scalar_select %p471_p12, 1, 0 }
  0x12   : > { %s480_s25 = scalar_lea.hbm %s578_s0, %s244_s21  ;;  %s91_s26 = scalar_lea.vmem [#allocation2], %s243_s22 }
  0x13   : > { %s98_s27 = sshll.u32 %s91_s26, 4  ;;  %p484_p13 = pnand %p265_p10, %p456_p5  ;;  %s488_s27 = int_to_ptr.vmem [resolvable:$true] %s98_s27 }
  0x14   : > { %s88_s29 = scalar_lea.sflag [#allocation3], %s87_s20  ;;  %s307_s30 = scalar_lea.hbm %s480_s25, 128 }
  0x15   : > { %p308_p2 = scmp.ne.s32.totalorder %s480_s25, %s307_s30  ;;  %p309_p3 = pneg %p484_p13 }
  0x16   : > { %s312_s4 = scalar_lea.hbm %s578_s0, 256  ;;  %p313_p5 = scmp.lt.u32.totalorder %s480_s25, %s578_s0 }
  0x17   : > { %p310_p4 = pnand %p309_p3, %p308_p2  ;;  %p314_p8 = scmp.lt.u32.totalorder %s312_s4, %s307_s30 }
  0x18   : > { %p316_p9 = scmp.lt.u32.totalorder %s307_s30, %s480_s25 }
  0x19   : > { %p311_p7 = pneg %p310_p4  ;;  %p315_p10 = por %p314_p8, %p313_p5 }
  0x1b   : > { %p317_p0 = por %p316_p9, %p315_p10 }
  0x1d   : > { %p318_p1 = pnand %p317_p0, %p311_p7 }
  0x1f   : > { %321 = shalt.err (!%p318_p1)
}
  0x20   : > { %s322_s13 = scalar_lea.vmem %s488_s27, 128  ;;  %s405_s14 = smov [#allocation2]  }
  0x21   : > { %p323_p2 = scmp.ne.s32.totalorder %s488_s27, %s322_s13  ;;  %s327_s16 = sshll.u32 %s405_s14, 4  ;;  %s328_s16 = int_to_ptr.vmem [resolvable:$false] %s327_s16 }
  0x22   : > { %s329_s20 = scalar_lea.vmem %s328_s16, 256  ;;  %p330_p11 = scmp.lt.s32.totalorder %s488_s27, %s328_s16 }
  0x23   : > { %p325_p4 = pnand %p323_p2, %p309_p3  ;;  %p331_p5 = scmp.lt.s32.totalorder %s329_s20, %s322_s13 }
  0x25   : > { %p326_p12 = pneg %p325_p4  ;;  %p332_p8 = por %p331_p5, %p330_p11 }
  0x27   : > { %p333_p9 = pnand %p332_p8, %p326_p12 }
  0x29   : > { %336 = shalt.err (!%p333_p9)
}
  0x2a   : > { %260 = dma.hbm_to_vmem [thread:$0]  (!%p484_p13), %s480_s25, 128, %s488_s27, %s88_s29  }
  0x2b   : > { %p586_p0 = scmp.lt.s32.totalorder %s403_s9, 3  ;;  %p587_p1 = scmp.ge.s32.totalorder %s403_s9, 1 }
  0x2d   : > { %p104_p3 = pnand %p587_p1, %p586_p0 }
  0x2e   : > { %s522_s21 = sand.u32 (!%p104_p3), 1, %s395_s7  }
  0x2f   : > { %107 = sbr.rel (%p104_p3) target bundleno = 415 (0x19f), region = 24  ;;  %s246_s22 = sshll.u32 (!%p104_p3), %s522_s21, 3 }
  0x30   : > { %s110_s23 = scalar_lea.sflag (!%p104_p3), [#allocation3], %s522_s21  ;;  %s113_s24 = scalar_lea.vmem (!%p104_p3), [#allocation2], %s246_s22 }
  0x36   : > { %382 = dma.done.wait (%p460_p6), %s110_s23, 128  }
  0x37   : > { %384 = vsyncadd (%p460_p6), %s110_s23, 4294967168  ;;  %v132_v0 = vld [vmem:[%s113_s24] sm:$0xff]  ;;  %v146_v10 = vlaneseq  ;;  %s250_s17 = sshll.u32 %s438_s10, 7  ;;  %s131_s25 = scalar_lea.vmem [#allocation5], %s246_s22 }
  0x38   : > { %v133_v1 = vand.u32 2147483647, %v132_v0  ;;  %s170_s26 = sshll.u32 %s131_s25, 4  ;;  %s534_s29 = scalar_lea.hbm %s579_s1, %s250_s17  ;;  %s536_s26 = int_to_ptr.vmem [resolvable:$true] %s170_s26 }
  0x39   : > { %v147_v11 = vand.u32 127, %v146_v10  ;;  %s157_s30 = scalar_lea.sflag [#allocation4], %s522_s21  ;;  %s337_s2 = scalar_lea.vmem %s536_s26, 128 }
  0x3a   : > { %134 = vadd.xlane.f32.xlu0 %v133_v1  ;;  %p338_p6 = scmp.ne.s32.totalorder %s536_s26, %s337_s2  ;;  %p588_p11 = scmp.ne.s32.totalorder %s583_s18, 0 }
  0x3b   : > { %vm148_vm0 = vcmp.lt.s32.totalorder %v147_v11, 32  ;;  %s406_s10 = smov [#allocation5]  }
  0x3c   : > { %p339_p12 = pnand %p338_p6, %p588_p11  ;;  %s341_s3 = sshll.u32 %s406_s10, 4  ;;  %s342_s3 = int_to_ptr.vmem [resolvable:$false] %s341_s3 }
  0x3d   : > { %s343_s4 = scalar_lea.vmem %s342_s3, 256  ;;  %p344_p7 = scmp.lt.s32.totalorder %s536_s26, %s342_s3 }
  0x3e   : > { %p340_p13 = pneg %p339_p12  ;;  %p345_p10 = scmp.lt.s32.totalorder %s343_s4, %s337_s2 }
  0x40   : > { %p346_p2 = por %p345_p10, %p344_p7 }
  0x42   : > { %p347_p4 = pnand %p346_p2, %p340_p13 }
  0xc7   : > { %v135_v2 = vpop.xlane.xlu0 %134 }
  0xc8   : > { %v136_v3 = vmul.f32 0.03125, %v135_v2 }
  0xca   : > { %v137_v4 = vadd.f32 1e-06, %v136_v3 }
  0xcc   : > { %299 = vrcp.f32 %v137_v4 }
  0xd6   : > { %v300_v5 = vpop.eup %299 }
  0xd7   : > { %v139_v6 = vmul.f32 %v300_v5, %v132_v0 }
  0xd9   : > { %v248_v7 = vmul.f32 -1.442695, %v139_v6 }
  0xdb   : > { %301 = vpow2.f32 %v248_v7 }
  0xe5   : > { %v302_v8 = vpop.eup %301 }
  0xe6   : > { %v143_v9 = vadd.f32 1.0, %v302_v8 }
  0xe8   : > { %303 = vrcp.f32 %v143_v9 }
  0xf2   : > { %v304_v12 = vpop.eup %303 }
  0xf3   : > { %v149_v13 = vsel %vm148_vm0, %v304_v12, 0.0 }
  0xf4   : > { %150 = vadd.xlane.f32.xlu0 %v149_v13 }
 0x181   : > { %v151_v14 = vpop.xlane.xlu0 %150 }
 0x182   : > { %v152_v15 = vadd.f32 1e-10, %v151_v14 }
 0x184   : > { %305 = vrcp.f32 %v152_v15 }
 0x18e   : > { %v306_v16 = vpop.eup %305 }
 0x18f   : > { %v154_v17 = vmul.f32 %v306_v16, %v149_v13 }
 0x191   : > { %155 = vst [vmem:[%s131_s25] sm:$0xff] %v154_v17 }
 0x192   : > { %350 = shalt.err (!%p347_p4)
}
 0x193   : > { %s351_s5 = scalar_lea.hbm %s534_s29, 128  ;;  %s355_s14 = scalar_lea.hbm %s579_s1, 256 }
 0x194   : > { %p352_p5 = scmp.ne.s32.totalorder %s534_s29, %s351_s5  ;;  %p356_p0 = scmp.lt.u32.totalorder %s534_s29, %s579_s1 }
 0x195   : > { %p357_p1 = scmp.lt.u32.totalorder %s355_s14, %s351_s5  ;;  %p359_p6 = scmp.lt.u32.totalorder %s351_s5, %s534_s29 }
 0x196   : > { %p353_p8 = pnand %p352_p5, %p588_p11 }
 0x197   : > { %p358_p3 = por %p357_p1, %p356_p0 }
 0x198   : > { %p354_p9 = pneg %p353_p8 }
 0x199   : > { %p360_p12 = por %p359_p6, %p358_p3 }
 0x19b   : > { %p361_p13 = pnand %p360_p12, %p354_p9 }
 0x19d   : > { %364 = shalt.err (!%p361_p13)
}
 0x19e   : > { %255 = dma.vmem_to_hbm [thread:$0]  (%p588_p11), %s536_s26, 128, %s534_s29, %s157_s30  }
 0x19f PF: > { %s182_s21 = sand.u32 1, %s391_s6   ;;  %p589_p7 = scmp.ne.s32.totalorder %s584_s19, 0 }
 0x1a0   : > { %p590_p10 = scmp.ge.s32.totalorder %s403_s9, 2  ;;  %s183_s22 = scalar_lea.sflag [#allocation4], %s182_s21 }
 0x1a2   : > { %p262_p2 = pnand %p590_p10, %p589_p7 }
 0x1a4   : > { %386 = dma.done.wait (!%p262_p2), %s183_s22, 128  }
 0x1a5   : > { %388 = vsyncadd (!%p262_p2), %s183_s22, 4294967168  ;;  %p14_p4 = scmp.ge.s32.totalorder %s442_s12, 4   ;;  %s591_s6 = smov %s395_s7 }
 0x1a6   : > { %s592_s7 = smov %s399_s8  ;;  %s593_s8 = smov %s454_s15 }
 0x1a7   : > { %s594_s9 = smov %s442_s12  ;;  %16 = sbr.rel (!%p14_p4) target bundleno = 5 (0x5), region = 69 }
 0x1ae   :  { %188 = vsyncpa [#allocation3], 1 }
 0x1af   :  { %190 = vsyncpa [#allocation3 + $0x1], 1 }
 0x1b0   :  { %191 = vsyncpa [#allocation4], 1 }
 0x1b1   :  { %193 = vsyncpa [#allocation4 + $0x1], 1 }

</bundles_post_ra>
